<compile_context>
chip_gen: v7x
topology: tpu7x:2x2x1
jax: 0.10.0
libtpu: 0.0.40
codegen_flags: <defaults>
</compile_context>

<pallas_src>
from functools import partial

import jax
import jax.numpy as jnp
from jax import lax
from jax.experimental import pallas as pl
from jax.experimental.pallas import tpu as pltpu

# Large finite negative value used for causal masking (avoids -inf NaN hazards).
_MASK_VALUE = -0.7 * float(jnp.finfo(jnp.float32).max)


def _qkv_proj_kernel(x_ref, w_ref, k_ref, q_ref, v_ref, *, n_heads, head_dim):
    """Per (batch, seq-tile): one fused (tt, C) @ (C, 3C) MXU GEMM; outputs are
    head-split and written directly in (H, tt, hd) layout."""
    x = x_ref[0]                                                    # (tt, C), native dtype
    C = n_heads * head_dim
    qkv = jnp.dot(x, w_ref[...], preferred_element_type=jnp.float32)  # (tt, 3C) f32 acc

    def split_heads(t):                                             # (tt, C) -> (H, tt, hd)
        return jnp.transpose(t.reshape(-1, n_heads, head_dim), (1, 0, 2))

    k_ref[0] = split_heads(qkv[:, :C]).astype(k_ref.dtype)
    q_ref[0] = split_heads(qkv[:, C:2 * C]).astype(q_ref.dtype)     # scale pre-folded
    v_ref[0] = split_heads(qkv[:, 2 * C:]).astype(v_ref.dtype)


def _flash_attn_proj_kernel(q_ref, k_ref, v_ref, wproj_ref, bproj_ref, o_ref,
                            m_sc, l_sc, acc_sc, *, tq, tk):
    """Online-softmax causal attention over KV tiles + fused output projection."""
    qi = pl.program_id(1)
    ki = pl.program_id(2)
    nk = pl.num_programs(2)

    @pl.when(ki == 0)
    def _init():
        m_sc[...] = jnp.full(m_sc.shape, _MASK_VALUE, m_sc.dtype)
        l_sc[...] = jnp.zeros(l_sc.shape, l_sc.dtype)
        acc_sc[...] = jnp.zeros(acc_sc.shape, acc_sc.dtype)

    # Skip KV tiles entirely above the causal diagonal (their DMAs are also clamped away
    # by the K/V index maps in the wrapper; tile 0 never skips).
    @pl.when(ki * tk <= qi * tq + (tq - 1))
    def _compute():
        q = q_ref[0]                               # (H, tq, hd) native dtype (scale folded)
        k = k_ref[0]                               # (H, tk, hd)
        v = v_ref[0]                               # (H, tk, hd)

        # Heads batched; contraction over hd; fp32 MXU accumulation from native operands.
        s = jnp.einsum('hqd,hkd->hqk', q, k,
                       preferred_element_type=jnp.float32)          # (H, tq, tk)

        # Per-tile causal mask from global row/col offsets (finite mask value).
        row = qi * tq + lax.broadcasted_iota(jnp.int32, (tq, tk), 0)
        col = ki * tk + lax.broadcasted_iota(jnp.int32, (tq, tk), 1)
        s = jnp.where((col <= row)[None, :, :], s, _MASK_VALUE)

        m_prev = m_sc[...]                                           # (H, tq, 1)
        m_new = jnp.maximum(m_prev, jnp.max(s, axis=-1, keepdims=True))
        alpha = jnp.exp(m_prev - m_new)
        p = jnp.exp(s - m_new)                                       # (H, tq, tk) f32

        l_sc[...] = alpha * l_sc[...] + jnp.sum(p, axis=-1, keepdims=True)
        acc_sc[...] = alpha * acc_sc[...] + jnp.einsum(
            'hqk,hkd->hqd', p.astype(v.dtype), v,
            preferred_element_type=jnp.float32)                      # (H, tq, hd)
        m_sc[...] = m_new

    @pl.when(ki == nk - 1)
    def _finalize():
        # Exact normalisation (runs once per q tile — cheap, tightens accuracy).
        attn = (acc_sc[...] / l_sc[...]).astype(wproj_ref.dtype)     # (H, tq, hd)
        # Head-concat folded into MXU accumulation: per-head (tq,hd)@(hd,C) then VPU sum
        # over heads — no swapaxes/reshape relayout in the epilogue.
        y = jnp.einsum('hqd,hdc->hqc', attn, wproj_ref[...],
                       preferred_element_type=jnp.float32).sum(axis=0)   # (tq, C)
        y = y + bproj_ref[...]
        o_ref[0] = y.astype(o_ref.dtype)


def multi_head_attention_efficient(x, w_qkv, w_proj, b_proj, n_heads,
                                   *, seq_tile=256, q_tile=256, kv_tile=256):
    B, T, C = x.shape
    assert C % n_heads == 0
    hd = C // n_heads
    scale = float(hd) ** -0.5

    # Trace-time weight plumbing (free): split k/q/v rows, fold scale into Q, transpose,
    # concatenate into a single (C, 3C) projection weight; reshape Wproj to (H, hd, C).
    wk_t = jnp.transpose(w_qkv[:C, :])                       # (C, C)
    wq_t = jnp.transpose(w_qkv[C:2 * C, :]) * scale          # (C, C), 1/sqrt(hd) folded
    wv_t = jnp.transpose(w_qkv[2 * C:, :])                   # (C, C)
    w_cat = jnp.concatenate([wk_t, wq_t, wv_t], axis=1).astype(x.dtype)   # (C, 3C)
    wproj_hdc = jnp.transpose(w_proj).reshape(n_heads, hd, C).astype(x.dtype)
    b_proj2 = b_proj.reshape(1, C).astype(jnp.float32)

    # Tile sizes: use the target if it evenly divides T (and respects sublane
    # alignment), otherwise fall back to the full sequence (valid for small T).
    def pick(tile):
        return tile if (T % tile == 0 and tile % 8 == 0) else T
    tt, tq, tk = pick(seq_tile), pick(q_tile), pick(kv_tile)

    # 48 MiB VMEM limit is safe on all generations (<= v7x's 64 MiB/TC budget);
    # v5e/v6e can be bumped to ~96 MiB with 512-wide tiles if desired.
    vmem_limit = 48 * 1024 * 1024

    # ---- Pass 1: fused QKV projection, outputs written head-major (B, H, T, hd) ----
    qkv_shape = jax.ShapeDtypeStruct((B, n_heads, T, hd), x.dtype)
    out_spec_hd = pl.BlockSpec((1, n_heads, tt, hd), lambda b, i: (b, 0, i, 0))
    k, q, v = pl.pallas_call(
        partial(_qkv_proj_kernel, n_heads=n_heads, head_dim=hd),
        out_shape=(qkv_shape, qkv_shape, qkv_shape),
        grid_spec=pltpu.PrefetchScalarGridSpec(
            num_scalar_prefetch=0,
            grid=(B, T // tt),
            in_specs=[
                pl.BlockSpec((1, tt, C), lambda b, i: (b, i, 0)),    # x tile
                pl.BlockSpec((C, 3 * C), lambda b, i: (0, 0)),       # [Wk|Wq*s|Wv]^T
            ],
            out_specs=[out_spec_hd, out_spec_hd, out_spec_hd],
        ),
        compiler_params=pltpu.CompilerParams(
            dimension_semantics=("parallel", "parallel"),
            vmem_limit_bytes=vmem_limit),
    )(x, w_cat)

    # ---- Pass 2: flash-style causal attention + fused output projection ----
    def last_kv(i):  # last causally-needed kv block for q tile i
        return (i * tq + tq - 1) // tk

    kernel = partial(_flash_attn_proj_kernel, tq=tq, tk=tk)
    out = pl.pallas_call(
        kernel,
        out_shape=jax.ShapeDtypeStruct((B, T, C), x.dtype),
        grid_spec=pltpu.PrefetchScalarGridSpec(
            num_scalar_prefetch=0,
            grid=(B, T // tq, T // tk),                  # KV reduction axis innermost
            in_specs=[
                pl.BlockSpec((1, n_heads, tq, hd), lambda b, i, j: (b, 0, i, 0)),  # Q
                # Clamp K/V block indices to the causal diagonal so Pallas elides the
                # DMAs for masked-out KV tiles (pl.when only skips compute).
                pl.BlockSpec((1, n_heads, tk, hd),
                             lambda b, i, j: (b, 0, jnp.minimum(j, last_kv(i)), 0)),  # K
                pl.BlockSpec((1, n_heads, tk, hd),
                             lambda b, i, j: (b, 0, jnp.minimum(j, last_kv(i)), 0)),  # V
                pl.BlockSpec((n_heads, hd, C), lambda b, i, j: (0, 0, 0)),  # Wproj (H,hd,C)
                pl.BlockSpec((1, C), lambda b, i, j: (0, 0)),               # bias
            ],
            out_specs=pl.BlockSpec((1, tq, C), lambda b, i, j: (b, i, 0)),
            scratch_shapes=[
                pltpu.VMEM((n_heads, tq, 1), jnp.float32),    # running max
                pltpu.VMEM((n_heads, tq, 1), jnp.float32),    # running sum
                pltpu.VMEM((n_heads, tq, hd), jnp.float32),   # output accumulator
            ],
        ),
        compiler_params=pltpu.CompilerParams(
            dimension_semantics=("parallel", "parallel", "arbitrary"),
            vmem_limit_bytes=vmem_limit),
    )(q, k, v, wproj_hdc, b_proj2)
    return out


def reference(x, w_qkv, w_proj, b_proj, n_heads):
    B, T, C = x.shape
    hd = C // n_heads
    qkv = x @ w_qkv.T                                    # (B, T, 3C)
    k, q, v = qkv[..., :C], qkv[..., C:2 * C], qkv[..., 2 * C:]

    def heads(t):
        return t.reshape(B, T, n_heads, hd).transpose(0, 2, 1, 3)
    k, q, v = heads(k), heads(q), heads(v)
    att = (q @ k.transpose(0, 1, 3, 2)) * hd ** -0.5
    mask = jnp.tril(jnp.ones((T, T), dtype=bool))
    att = jnp.where(mask, att, -jnp.inf)
    att = jax.nn.softmax(att, axis=-1)
    out = (att @ v).transpose(0, 2, 1, 3).reshape(B, T, C)
    return out @ w_proj.T + b_proj


if __name__ == "__main__":
    # Small GPTConfig-like shapes: block_size=8, n_embedding=32, n_heads=4.
    B, T, C, n_heads = 2, 8, 32, 4

    key = jax.random.PRNGKey(0)
    kx, k1, k2, k3 = jax.random.split(key, 4)

    x = jax.random.normal(kx, (B, T, C), dtype=jnp.float32)

    # Deterministic PyTorch-style init: U(-1/sqrt(fan_in), 1/sqrt(fan_in)).
    bound = 1.0 / (C ** 0.5)
    w_qkv = jax.random.uniform(k1, (3 * C, C), jnp.float32, -bound, bound)
    w_proj = jax.random.uniform(k2, (C, C), jnp.float32, -bound, bound)
    b_proj = jax.random.uniform(k3, (1, C), jnp.float32, -bound, bound)

    out = multi_head_attention_efficient(x, w_qkv, w_proj, b_proj, n_heads)
    out = jax.block_until_ready(out)

    ref = reference(x, w_qkv, w_proj, b_proj, n_heads)
    assert out.shape == (B, T, C)
    max_err = jnp.max(jnp.abs(out - ref))
    assert jnp.allclose(out, ref, atol=1e-3, rtol=1e-3), \
        f"mismatch vs reference (max abs err {max_err})"

    print("KERNEL_OK")
</pallas_src>

<mosaic_0001>
module attributes {stable_mosaic.version = 11 : i64} {
  func.func @_qkv_proj_kernel(%arg0: i32, %arg1: i32, %arg2: memref<1x8x32xf32, #tpu.memory_space<vmem>>, %arg3: memref<32x96xf32, #tpu.memory_space<vmem>>, %arg4: memref<1x4x8x8xf32, #tpu.memory_space<vmem>>, %arg5: memref<1x4x8x8xf32, #tpu.memory_space<vmem>>, %arg6: memref<1x4x8x8xf32, #tpu.memory_space<vmem>>) attributes {dimension_semantics = [#tpu.dimension_semantics<parallel>, #tpu.dimension_semantics<parallel>], iteration_bounds = array<i64: 2, 1>, scalar_prefetch = 0 : i64, scratch_operands = 0 : i64, tpu.core_type = #tpu.core_type<tc>, window_params = [{transform_indices = @transform_0, window_bounds = array<i64: 1, 8, 32>}, {pipeline_mode = #tpu.pipeline_mode<synchronous>, transform_indices = @transform_1, window_bounds = array<i64: 32, 96>}, {transform_indices = @transform_2, window_bounds = array<i64: 1, 4, 8, 8>}, {transform_indices = @transform_3, window_bounds = array<i64: 1, 4, 8, 8>}, {transform_indices = @transform_4, window_bounds = array<i64: 1, 4, 8, 8>}]} {
    %c0 = arith.constant 0 : index
    %c0_0 = arith.constant 0 : index
    %c0_1 = arith.constant 0 : index
    %0 = vector.load %arg2[%c0, %c0_0, %c0_1] : memref<1x8x32xf32, #tpu.memory_space<vmem>>, vector<1x8x32xf32>
    %1 = vector.shape_cast %0 : vector<1x8x32xf32> to vector<8x32xf32>
    %c0_2 = arith.constant 0 : index
    %c0_3 = arith.constant 0 : index
    %2 = vector.load %arg3[%c0_2, %c0_3] : memref<32x96xf32, #tpu.memory_space<vmem>>, vector<32x96xf32>
    %cst = arith.constant dense<0.000000e+00> : vector<8x96xf32>
    %3 = tpu.matmul %1, %2, %cst {dimension_numbers = #tpu.dot_dimension_numbers<[1], [0], [0], [1], [0, 0, 1, 1], [], []>} : vector<8x32xf32>, vector<32x96xf32>, vector<8x96xf32> -> vector<8x96xf32>
    %4 = vector.extract_strided_slice %3 {offsets = [0, 0], sizes = [8, 32], strides = [1, 1]} : vector<8x96xf32> to vector<8x32xf32>
    %5 = vector.shape_cast %4 : vector<8x32xf32> to vector<8x4x8xf32>
    %6 = tpu.transpose %5, [1, 0, 2] : vector<8x4x8xf32> -> vector<4x8x8xf32>
    %c0_4 = arith.constant 0 : index
    %c0_5 = arith.constant 0 : index
    %c0_6 = arith.constant 0 : index
    %c0_7 = arith.constant 0 : index
    %7 = vector.load %arg4[%c0_4, %c0_5, %c0_6, %c0_7] : memref<1x4x8x8xf32, #tpu.memory_space<vmem>>, vector<1x4x8x8xf32>
    %8 = vector.shape_cast %7 : vector<1x4x8x8xf32> to vector<4x8x8xf32>
    %9 = vector.shape_cast %6 : vector<4x8x8xf32> to vector<1x4x8x8xf32>
    tpu.vector_store %arg4[%c0_4, %c0_5, %c0_6, %c0_7], %9 {strides = array<i32>} : memref<1x4x8x8xf32, #tpu.memory_space<vmem>>, vector<1x4x8x8xf32>,
    %10 = vector.extract_strided_slice %3 {offsets = [0, 32], sizes = [8, 32], strides = [1, 1]} : vector<8x96xf32> to vector<8x32xf32>
    %11 = vector.shape_cast %10 : vector<8x32xf32> to vector<8x4x8xf32>
    %12 = tpu.transpose %11, [1, 0, 2] : vector<8x4x8xf32> -> vector<4x8x8xf32>
    %c0_8 = arith.constant 0 : index
    %c0_9 = arith.constant 0 : index
    %c0_10 = arith.constant 0 : index
    %c0_11 = arith.constant 0 : index
    %13 = vector.load %arg5[%c0_8, %c0_9, %c0_10, %c0_11] : memref<1x4x8x8xf32, #tpu.memory_space<vmem>>, vector<1x4x8x8xf32>
    %14 = vector.shape_cast %13 : vector<1x4x8x8xf32> to vector<4x8x8xf32>
    %15 = vector.shape_cast %12 : vector<4x8x8xf32> to vector<1x4x8x8xf32>
    tpu.vector_store %arg5[%c0_8, %c0_9, %c0_10, %c0_11], %15 {strides = array<i32>} : memref<1x4x8x8xf32, #tpu.memory_space<vmem>>, vector<1x4x8x8xf32>,
    %16 = vector.extract_strided_slice %3 {offsets = [0, 64], sizes = [8, 32], strides = [1, 1]} : vector<8x96xf32> to vector<8x32xf32>
    %17 = vector.shape_cast %16 : vector<8x32xf32> to vector<8x4x8xf32>
    %18 = tpu.transpose %17, [1, 0, 2] : vector<8x4x8xf32> -> vector<4x8x8xf32>
    %c0_12 = arith.constant 0 : index
    %c0_13 = arith.constant 0 : index
    %c0_14 = arith.constant 0 : index
    %c0_15 = arith.constant 0 : index
    %19 = vector.load %arg6[%c0_12, %c0_13, %c0_14, %c0_15] : memref<1x4x8x8xf32, #tpu.memory_space<vmem>>, vector<1x4x8x8xf32>
    %20 = vector.shape_cast %19 : vector<1x4x8x8xf32> to vector<4x8x8xf32>
    %21 = vector.shape_cast %18 : vector<4x8x8xf32> to vector<1x4x8x8xf32>
    tpu.vector_store %arg6[%c0_12, %c0_13, %c0_14, %c0_15], %21 {strides = array<i32>} : memref<1x4x8x8xf32, #tpu.memory_space<vmem>>, vector<1x4x8x8xf32>,
    return
  }
  func.func @transform_0(%arg0: i32, %arg1: i32) -> (i32, i32, i32) {
    %c0_i32 = arith.constant 0 : i32
    %c0_i32_0 = arith.constant 0 : i32
    return %arg0, %arg1, %c0_i32 : i32, i32, i32
  }
  func.func @transform_1(%arg0: i32, %arg1: i32) -> (i32, i32) {
    %c0_i32 = arith.constant 0 : i32
    %c0_i32_0 = arith.constant 0 : i32
    %c0_i32_1 = arith.constant 0 : i32
    return %c0_i32, %c0_i32_0 : i32, i32
  }
  func.func @transform_2(%arg0: i32, %arg1: i32) -> (i32, i32, i32, i32) {
    %c0_i32 = arith.constant 0 : i32
    %c0_i32_0 = arith.constant 0 : i32
    %c0_i32_1 = arith.constant 0 : i32
    return %arg0, %c0_i32, %arg1, %c0_i32_0 : i32, i32, i32, i32
  }
  func.func @transform_3(%arg0: i32, %arg1: i32) -> (i32, i32, i32, i32) {
    %c0_i32 = arith.constant 0 : i32
    %c0_i32_0 = arith.constant 0 : i32
    %c0_i32_1 = arith.constant 0 : i32
    return %arg0, %c0_i32, %arg1, %c0_i32_0 : i32, i32, i32, i32
  }
  func.func @transform_4(%arg0: i32, %arg1: i32) -> (i32, i32, i32, i32) {
    %c0_i32 = arith.constant 0 : i32
    %c0_i32_0 = arith.constant 0 : i32
    %c0_i32_1 = arith.constant 0 : i32
    return %arg0, %c0_i32, %arg1, %c0_i32_0 : i32, i32, i32, i32
  }
}

</mosaic_0001>

<bundles_post_ra>
// kernel: tpu_custom_call.1
= control target key start
LH: loop header
LB: loop body
LE: loop exit
PB: predicated region body
PF: predicated region fallthrough
CT: control target
= control target key end

     0   :  { %10 = vsyncpa [#allocation3], 0  ;;  %s1789_s0 = inlined_call_operand.hbm [shape: f32[2,8,32], index: 0, kind: input, shape index: {}]   ;;  %s1790_s1 = inlined_call_operand.hbm [shape: f32[32,96], index: 1, kind: input, shape index: {}]   ;;  %s1791_s2 = inlined_call_operand.hbm [shape: f32[2,4,8,8], index: 2, kind: output, shape index: {0}]   ;;  %s1792_s3 = inlined_call_operand.hbm [shape: f32[2,4,8,8], index: 3, kind: output, shape index: {1}]   ;;  %s1793_s4 = inlined_call_operand.hbm [shape: f32[2,4,8,8], index: 4, kind: output, shape index: {2}]  }
   0x1   :  { %12 = vsyncpa [#allocation3 + $0x1], 0 }
   0x2   :  { %13 = vsyncpa [#allocation6], 0 }
   0x3   :  { %14 = vsyncpa [#allocation4], 0 }
   0x4   :  { %16 = vsyncpa [#allocation4 + $0x1], 0 }
   0x5   :  { %17 = vsyncpa [#allocation9], 0 }
   0x6   :  { %19 = vsyncpa [#allocation9 + $0x1], 0  ;;  %s1422_s15 = smov 0   ;;  %s1424_s16 = smov 0  }
   0x7   :  { %s1426_s17 = smov 0   ;;  %s1428_s18 = smov 0  }
   0x8   :  { %s1430_s19 = smov 0   ;;  %s1432_s20 = smov 0  }
   0x9 LB: > { %s1453_s21 = sadd.s32 4294967295, %s1376_s20   ;;  %s1020_s22 = sadd.s32 4294967294, %s1376_s20   ;;  %s1376_s20 = sphi %s1432_s20, %s25_s20   ;;  %s1372_s19 = sphi %s1430_s19, %s1815_s19   ;;  %s1368_s18 = sphi %s1428_s18, %s1814_s18   ;;  %s1364_s17 = sphi %s1426_s17, %s1813_s17   ;;  %s1360_s16 = sphi %s1424_s16, %s1812_s16   ;;  %s1356_s15 = sphi %s1422_s15, %s1811_s15  }
   0xa   : > { %p59_p0 = scmp.ne.s32.totalorder %s1360_s16, %s1356_s15  ;;  %p1794_p1 = scmp.eq.s32.totalorder %s1453_s21, 0 }
   0xb   : > { %p112_p3 = scmp.eq.s32.totalorder %s1020_s22, 1  ;;  %p1021_p5 = scmp.ge.s32.totalorder %s1376_s20, 1 }
   0xc   : > { %p1464_p4 = por %p1794_p1, %p59_p0  ;;  %p175_p7 = scmp.lt.s32.totalorder %s1376_s20, 3 }
   0xd   : > { %p1469_p6 = por %p112_p3, %p59_p0  ;;  %s1378_s26 = smov [#allocation5]  }
   0xe   : > { %s1797_s23 = scalar_select %p1464_p4, 1, 0 }
   0xf   : > { %s1798_s24 = scalar_select %p1469_p6, 1, 0 }
  0x10   : > { %p1474_p8 = pnand %p1021_p5, %p175_p7  ;;  %s187_s27 = sshll.u32 %s1378_s26, 4  ;;  %s188_s27 = int_to_ptr.vmem [resolvable:$true] %s187_s27 }
  0x11   : > { %s37_s29 = sadd.s32 1, %s1372_s19  ;;  %s1172_s6 = scalar_lea.hbm %s1790_s1, 512 }
  0x12   : > { %s1799_s25 = scalar_select %p1474_p8, 1, 0 }
  0x13   : > { %p1087_p9 = pneg %p1474_p8  ;;  %p1173_p12 = scmp.ne.s32.totalorder %s1790_s1, %s1172_s6 }
  0x14   : > { %p1179_p5 = scmp.lt.u32.totalorder %s1172_s6, %s1790_s1 }
  0x15   : > { %p1483_p11 = pnand %p1087_p9, %p1794_p1 }
  0x17   : > { %p1174_p13 = pneg %p1483_p11 }
  0x19   : > { %p1175_p0 = pnand %p1174_p13, %p1173_p12 }
  0x1b   : > { %p1176_p3 = pneg %p1175_p0 }
  0x1d   : > { %p1181_p7 = pnand %p1179_p5, %p1176_p3 }
  0x1f   : > { %1184 = shalt.err (!%p1181_p7)
}
  0x20   : > { %s1185_s11 = scalar_lea.vmem %s188_s27, 512  ;;  %p1193_p2 = scmp.lt.s32.totalorder %s188_s27, %s188_s27 }
  0x21   : > { %p1186_p9 = scmp.ne.s32.totalorder %s188_s27, %s1185_s11  ;;  %p1194_p6 = scmp.lt.s32.totalorder %s1185_s11, %s1185_s11 }
  0x23   : > { %p1188_p10 = pnand %p1186_p9, %p1174_p13  ;;  %p1195_p4 = por %p1194_p6, %p1193_p2 }
  0x25   : > { %p1189_p1 = pneg %p1188_p10 }
  0x27   : > { %p1196_p8 = pnand %p1195_p4, %p1189_p1 }
  0x29   : > { %1199 = shalt.err (!%p1196_p8)
}
  0x2a   : > { %s1379_s12 = smov 128   ;;  %s1380_s13 = smov 8  }
  0x2b   : > { %1090 = dma.hbm_to_vmem [thread:$0]  (!%p1483_p11), %s1790_s1, 512, %s188_s27, [#allocation6], %s1379_s12, %s1379_s12, %s1380_s13  }
  0x2c   : > { %p39_p1 = scmp.ge.s32.totalorder %s37_s29, 2  ;;  %s46_s30 = sadd.s32 1, %s1364_s17 }
  0x2d   : > { %p53_p2 = scmp.ne.s32.totalorder %s1364_s17, %s1360_s16  ;;  %p54_p4 = scmp.eq.s32.totalorder %s1376_s20, 0 }
  0x2e   : > { %s1817_s29 = smov (%p39_p1, %s37_s29), 0  ;;  %p1802_p8 = scmp.eq.s32.totalorder %s1453_s21, 1 }
  0x2f   : > { %p1510_p6 = por %p54_p4, %p53_p2  ;;  %s41_s28 = ssub.s32 %s1372_s19, %s1817_s29 }
  0x30   : > { %p1516_p10 = por %p1802_p8, %p53_p2  ;;  %p1106_p12 = scmp.lt.s32.totalorder %s1376_s20, 2 }
  0x31   : > { %p44_p11 = scmp.eq.s32.totalorder %s41_s28, 0  ;;  %s201_s27 = sand.u32 1, %s1364_s17  }
  0x32   : > { %s1024_s7 = sshll.u32 %s201_s27, 3  ;;  %s1025_s9 = sshll.u32 %s1372_s19, 7 }
  0x33   : > { %s1525_s8 = scalar_select %p44_p11, %s1364_s17, %s46_s30  }
  0x34   : > { %s1531_s12 = scalar_lea.hbm %s1789_s0, %s1025_s9  ;;  %s205_s13 = scalar_lea.vmem [#allocation2], %s1024_s7 }
  0x35   : > { %s213_s14 = sshll.u32 %s205_s13, 4  ;;  %p1537_p13 = pnand %p1106_p12, %p1510_p6  ;;  %s1533_s14 = int_to_ptr.vmem [resolvable:$true] %s213_s14 }
  0x36   : > { %s202_s30 = scalar_lea.sflag [#allocation3], %s201_s27  ;;  %s1200_s28 = scalar_lea.hbm %s1531_s12, 128 }
  0x37   : > { %p1201_p0 = scmp.ne.s32.totalorder %s1531_s12, %s1200_s28  ;;  %p1202_p3 = pneg %p1537_p13 }
  0x38   : > { %s1205_s10 = scalar_lea.hbm %s1789_s0, 256  ;;  %p1206_p9 = scmp.lt.u32.totalorder %s1531_s12, %s1789_s0 }
  0x39   : > { %p1203_p5 = pnand %p1202_p3, %p1201_p0  ;;  %p1207_p1 = scmp.lt.u32.totalorder %s1205_s10, %s1200_s28 }
  0x3a   : > { %p1209_p4 = scmp.lt.u32.totalorder %s1200_s28, %s1531_s12 }
  0x3b   : > { %p1204_p7 = pneg %p1203_p5  ;;  %p1208_p2 = por %p1207_p1, %p1206_p9 }
  0x3d   : > { %p1210_p6 = por %p1209_p4, %p1208_p2 }
  0x3f   : > { %p1211_p8 = pnand %p1210_p6, %p1204_p7 }
  0x41   : > { %1214 = shalt.err (!%p1211_p8)
}
  0x42   : > { %s1215_s27 = scalar_lea.vmem %s1533_s14, 128  ;;  %s1381_s13 = smov [#allocation2]  }
  0x43   : > { %p1216_p12 = scmp.ne.s32.totalorder %s1533_s14, %s1215_s27  ;;  %s1220_s7 = sshll.u32 %s1381_s13, 4  ;;  %s1221_s7 = int_to_ptr.vmem [resolvable:$false] %s1220_s7 }
  0x44   : > { %s1222_s9 = scalar_lea.vmem %s1221_s7, 256  ;;  %p1223_p5 = scmp.lt.s32.totalorder %s1533_s14, %s1221_s7 }
  0x45   : > { %p1218_p11 = pnand %p1216_p12, %p1202_p3  ;;  %p1224_p9 = scmp.lt.s32.totalorder %s1222_s9, %s1215_s27 }
  0x47   : > { %p1219_p0 = pneg %p1218_p11  ;;  %p1225_p1 = por %p1224_p9, %p1223_p5 }
  0x49   : > { %p1226_p2 = pnand %p1225_p1, %p1219_p0 }
  0x4b   : > { %1229 = shalt.err (!%p1226_p2)
}
  0x4c   : > { %1094 = dma.hbm_to_vmem [thread:$0]  (!%p1537_p13), %s1531_s12, 128, %s1533_s14, %s202_s30  }
  0x4d   : > { %p1805_p7 = scmp.ne.s32.totalorder %s1799_s25, 0 }
  0x4e   : > { %s1569_s28 = sand.u32 (!%p1805_p7), 1, %s1360_s16   ;;  %p1806_p3 = scmp.ne.s32.totalorder (!%p1805_p7), %s1797_s23, 0 }
  0x4f   : > { %222 = sbr.rel (%p1805_p7) target bundleno = 604 (0x25c), region = 28  ;;  %s1027_s10 = sshll.u32 (!%p1805_p7), %s1569_s28, 3 }
  0x50   : > { %s225_s5 = scalar_lea.sflag (!%p1805_p7), [#allocation3], %s1569_s28  ;;  %s228_s11 = scalar_lea.vmem (!%p1805_p7), [#allocation2], %s1027_s10 }
  0x56   : > { %1339 = dma.done.wait (%p1806_p3), %s225_s5, 128  }
  0x57   : > { %1341 = vsyncadd (%p1806_p3), %s225_s5, 4294967168  ;;  %p1807_p4 = scmp.eq.s32.totalorder %s1453_s21, 0 }
  0x59   : > { %1343 = dma.done.wait (%p1807_p4), [#allocation6], 512   ;;  %p1808_p13 = pmov %p1807_p4 }
  0x5a   : > { %v1382_v0 = vmov 0.0|0.0   ;;  %vm1383_vm0 = vmmov 0   ;;  %v1384_v1 = vmov 0.0   ;;  %v268_v2 = vld [vmem:[#allocation5] sm:$0xff]  ;;  %v269_v3 = vld [vmem:[#allocation5 + $0x8] sm:$0xff]  ;;  %v270_v4 = vld [vmem:[#allocation5 + $0x10] sm:$0xff]  ;;  %v361_v13 = vlaneseq }
  0x5b   : > { %1345 = vsyncadd (%p1808_p13), [#allocation6], 4294966784  ;;  %1069 = vmatprep.subr.bf16.mxu0 %v1382_v0  ;;  %1066 = vmatprep.mubr.msk.f32.mxu0 %vm1383_vm0, %v1384_v1  ;;  %v1070_v5 = vpack.c.bf16 %v269_v3, %v268_v2  ;;  %v271_v6 = vld [vmem:[#allocation5 + $0x18] sm:$0xff]  ;;  %vm272_vm1 = vcmask 261120   ;;  %s1385_s23 = smov 104   ;;  %s1386_s25 = smov 120  }
  0x5c   : > { %v1073_v7 = vpack.c.bf16 %v271_v6, %v270_v4  ;;  %v267_v8 = vld [vmem:[%s228_s11] sm:$0xff]  ;;  %s1387_s12 = smov 96   ;;  %s1388_s14 = smov 112   ;;  %v1390_v11 = vmov 1983009808   ;;  %v362_v17 = vshrl.u32 %v361_v13, 7 }
  0x5d   : > { %1071 = vmatpush3.bf16.msra.mxu0 %v1070_v5  ;;  %s1389_s26 = smov 64   ;;  %v359_v12 = vunpack.c.l.s4 %v1390_v11  ;;  %v1391_v14 = vmov 1934713408   ;;  %s1602_s30 = sshll.u32 %s1569_s28, 5  ;;  %vm492_vm2 = vcmask 64512  }
  0x5e   : > { %1072 = vmatprep.subr.bf16.mxu0 %v1382_v0  ;;  %v391_v15 = vunpack.c.l.s4 %v1391_v14  ;;  %s1609_s27 = sshll.u32 %s1368_s18, 9  ;;  %s252_s10 = scalar_lea.vmem [#allocation7], %s1602_s30 }
  0x5f   : > { %v360_v16 = vunpack.c.0.s8 %v359_v12  ;;  %s1615_s9 = scalar_lea.hbm %s1791_s2, %s1609_s27  ;;  %s826_s5 = sshll.u32 %s252_s10, 4  ;;  %s1622_s5 = int_to_ptr.vmem [resolvable:$true] %s826_s5 }
  0x60   : > { %v392_v20 = vunpack.c.0.s8 %v391_v15  ;;  %s802_s18 = scalar_lea.sflag [#allocation4], %s1569_s28  ;;  %s1230_s11 = scalar_lea.vmem %s1622_s5, 512 }
  0x61   : > { %1074 = vmatpush3.bf16.msra.mxu0 %v1073_v7  ;;  %v1582_v21 = vsub.s32 %v360_v16, %v362_v17  ;;  %p1231_p6 = scmp.ne.s32.totalorder %s1622_s5, %s1230_s11 }
  0x62   : > { %v1584_v27 = vsub.s32 %v392_v20, %v362_v17 }
  0x63   : > { %p1232_p8 = pnand %p1231_p6, %p1516_p10 }
  0x64   : > { %1067 = vmatmul.mubr.msk.f32.vlgmr.msra.gmra.mrb[0].mxu0 %vm272_vm1, %v267_v8 }
  0x65   : > { %p1233_p12 = pneg %p1232_p8 }
 0x137   : > { %v342_v9 = vpop.f32.mrb[0].mxu0 }
 0x138   : > { %353 = vrot.lane.b32.xlu1 %v342_v9, %s1385_s23  ;;  %347 = vrot.lane.b32.xlu0 %v342_v9, %s1386_s25  ;;  %v1068_v10 = vpop.f32.mrb[1].mxu0  ;;  %s1392_s23 = smov [#allocation7]  }
 0x139   : > { %s1234_s25 = sshll.u32 %s1392_s23, 4  ;;  %s1235_s25 = int_to_ptr.vmem [resolvable:$false] %s1234_s25 }
 0x13a   : > { %p1237_p11 = scmp.lt.s32.totalorder %s1622_s5, %s1235_s25 }
 0x13c   : > { %497 = vrot.lane.b32.xlu1 %v342_v9, %s1387_s12  ;;  %350 = vrot.lane.b32.xlu0 %v342_v9, %s1388_s14 }
 0x140   : > { %649 = vrot.lane.b32.xlu1 %v342_v9, %s1389_s26 }
 0x1aa   : > { %v354_v18 = vpop.permute.xlu1 %353  ;;  %v348_v19 = vpop.permute.xlu0 %347 }
 0x1ab   : > { %499 = vrot.lane.b32.xlu0 %v348_v19, %s1387_s12  ;;  %v372_v22 = vcombine.low %v348_v19, %v354_v18  ;;  %v373_v23 = vcombine.high %v348_v19, %v354_v18 }
 0x1ad   : > { %v380_v28 = vrot.slane %v372_v22, %v1582_v21  ;;  %v387_v29 = vrot.slane %v373_v23, %v1582_v21 }
 0x1ae   : > { %v351_v24 = vpop.permute.xlu0 %350 }
 0x1af   : > { %v356_v25 = vcombine.low %v342_v9, %v351_v24  ;;  %v357_v26 = vcombine.high %v342_v9, %v351_v24  ;;  %503 = vrot.lane.b32.xlu0 %v354_v18, %s1387_s12  ;;  %501 = vrot.lane.b32.xlu1 %v351_v24, %s1387_s12  ;;  %s1236_s12 = scalar_lea.vmem %s1235_s25, 1024 }
 0x1b0   : > { %p1238_p0 = scmp.lt.s32.totalorder %s1236_s12, %s1230_s11 }
 0x1b1   : > { %v364_v30 = vrot.slane %v356_v25, %v1582_v21  ;;  %v371_v31 = vrot.slane %v357_v26, %v1582_v21 }
 0x1b2   : > { %p1239_p5 = por %p1238_p0, %p1237_p11 }
 0x1b3   : > { %v388_v32 = vcombine.low %v364_v30, %v380_v28  ;;  %v389_v33 = vcombine.high %v364_v30, %v380_v28  ;;  %v404_v34 = vcombine.low %v371_v31, %v387_v29  ;;  %v405_v35 = vcombine.high %v371_v31, %v387_v29  ;;  %651 = vrot.lane.b32.xlu0 %v348_v19, %s1389_s26 }
 0x1b4   : > { %653 = vrot.lane.b32.xlu1 %v351_v24, %s1389_s26  ;;  %p1240_p9 = pnand %p1239_p5, %p1233_p12 }
 0x1b5   : > { %v396_v36 = vrot.slane %v388_v32, %v1584_v27  ;;  %v403_v37 = vrot.slane %v389_v33, %v1584_v27  ;;  %v412_v38 = vrot.slane %v404_v34, %v1584_v27  ;;  %v419_v39 = vrot.slane %v405_v35, %v1584_v27 }
 0x1b7   : > { %v424_v40 = vcombine.low %v396_v36, %v403_v37  ;;  %v1033_v41 = vcombine.high %v396_v36, %v403_v37  ;;  %v440_v42 = vcombine.low %v412_v38, %v419_v39  ;;  %v1034_v43 = vcombine.high %v412_v38, %v419_v39  ;;  %655 = vrot.lane.b32.xlu0 %v354_v18, %s1389_s26 }
 0x1b9   : > { %v431_v44 = vrot.slane %v424_v40, %v1582_v21  ;;  %v439_v45 = vrot.slane %v1033_v41, %v1582_v21  ;;  %v447_v46 = vrot.slane %v440_v42, %v1582_v21  ;;  %v455_v47 = vrot.slane %v1034_v43, %v1582_v21 }
 0x1bb   : > { %v456_v48 = vcombine.low %v431_v44, %v439_v45  ;;  %v457_v49 = vcombine.high %v431_v44, %v439_v45  ;;  %v472_v50 = vcombine.low %v447_v46, %v455_v47  ;;  %v473_v51 = vcombine.high %v447_v46, %v455_v47 }
 0x1bd   : > { %v464_v52 = vrot.slane %v456_v48, %v1584_v27  ;;  %v471_v53 = vrot.slane %v457_v49, %v1584_v27  ;;  %v480_v54 = vrot.slane %v472_v50, %v1584_v27  ;;  %v487_v55 = vrot.slane %v473_v51, %v1584_v27 }
 0x1bf   : > { %v488_v56 = vcombine.low %v464_v52, %v480_v54  ;;  %v489_v57 = vcombine.high %v464_v52, %v480_v54  ;;  %v490_v58 = vcombine.low %v471_v53, %v487_v55  ;;  %v491_v59 = vcombine.high %v471_v53, %v487_v55 }
 0x1c1   : > { %493 = vst.msk [vmem:[%s252_s10] sm:$0xff] %vm492_vm2, %v488_v56  ;;  %494 = vst.msk [vmem:[%s252_s10 + $0x8] sm:$0xff] %vm492_vm2, %v489_v57 }
 0x1c2   : > { %495 = vst.msk [vmem:[%s252_s10 + $0x10] sm:$0xff] %vm492_vm2, %v490_v58  ;;  %496 = vst.msk [vmem:[%s252_s10 + $0x18] sm:$0xff] %vm492_vm2, %v491_v59 }
 0x1c3   : > { %1243 = shalt.err (!%p1240_p9)
}
 0x1c4   : > { %s1244_s14 = scalar_lea.hbm %s1615_s9, 512  ;;  %s1248_s7 = scalar_lea.hbm %s1791_s2, 1024 }
 0x1c5   : > { %p1245_p1 = scmp.ne.s32.totalorder %s1615_s9, %s1244_s14  ;;  %p1249_p3 = scmp.lt.u32.totalorder %s1615_s9, %s1791_s2 }
 0x1c6   : > { %p1250_p4 = scmp.lt.u32.totalorder %s1248_s7, %s1244_s14  ;;  %p1252_p6 = scmp.lt.u32.totalorder %s1244_s14, %s1615_s9 }
 0x1c7   : > { %p1246_p2 = pnand %p1245_p1, %p1516_p10 }
 0x1c8   : > { %p1251_p13 = por %p1250_p4, %p1249_p3 }
 0x1c9   : > { %p1247_p7 = pneg %p1246_p2 }
 0x1ca   : > { %p1253_p8 = por %p1252_p6, %p1251_p13 }
 0x1cc   : > { %p1254_p12 = pnand %p1253_p8, %p1247_p7 }
 0x1ce   : > { %1257 = shalt.err (!%p1254_p12)
}
 0x1cf   : > { %s1393_s11 = smov 128   ;;  %s1394_s25 = smov 8   ;;  %v498_v60 = vpop.permute.xlu1 %497 }
 0x1d0   : > { %1081 = dma.vmem_to_hbm [thread:$0]  (%p1516_p10), %s1622_s5, 512, %s1615_s9, %s802_s18, %s1393_s11, %s1393_s11, %s1394_s25  }
 0x1d1   : > { %s806_s28 = sand.u32 1, %s1453_s21   ;;  %s259_s9 = scalar_lea.vmem [#allocation8], %s1602_s30 }
 0x1d2   : > { %s843_s5 = sshll.u32 %s259_s9, 4  ;;  %s1681_s14 = scalar_lea.hbm %s1792_s3, %s1609_s27  ;;  %s1683_s5 = int_to_ptr.vmem [resolvable:$true] %s843_s5 }
 0x1d3   : > { %v650_v61 = vpop.permute.xlu1 %649  ;;  %s1695_s26 = scalar_lea.sflag [#allocation9], %s806_s28  ;;  %s1258_s13 = scalar_lea.vmem %s1683_s5, 512 }
 0x1d4   : > { %p1259_p11 = scmp.ne.s32.totalorder %s1683_s5, %s1258_s13  ;;  %s1395_s7 = smov [#allocation8]  }
 0x1d5   : > { %s1262_s10 = sshll.u32 %s1395_s7, 4  ;;  %s1263_s10 = int_to_ptr.vmem [resolvable:$false] %s1262_s10 }
 0x1d6   : > { %p1260_p0 = pnand %p1259_p11, %p1516_p10  ;;  %s1264_s23 = scalar_lea.vmem %s1263_s10, 1024 }
 0x1d7   : > { %p1265_p9 = scmp.lt.s32.totalorder %s1683_s5, %s1263_s10  ;;  %p1266_p1 = scmp.lt.s32.totalorder %s1264_s23, %s1258_s13 }
 0x1d8   : > { %p1261_p5 = pneg %p1260_p0 }
 0x1d9   : > { %p1267_p2 = por %p1266_p1, %p1265_p9 }
 0x1db   : > { %p1268_p7 = pnand %p1267_p2, %p1261_p5 }
 0x21d   : > { %v500_v62 = vpop.permute.xlu0 %499 }
 0x221   : > { %v502_v63 = vpop.permute.xlu1 %501  ;;  %v504_v0 = vpop.permute.xlu0 %503 }
 0x222   : > { %v509_v1 = vcombine.low %v498_v60, %v502_v63  ;;  %v510_v2 = vcombine.high %v498_v60, %v502_v63  ;;  %v525_v3 = vcombine.low %v500_v62, %v504_v0  ;;  %v526_v4 = vcombine.high %v500_v62, %v504_v0 }
 0x224   : > { %v517_v5 = vrot.slane %v509_v1, %v1582_v21  ;;  %v524_v6 = vrot.slane %v510_v2, %v1582_v21  ;;  %v533_v7 = vrot.slane %v525_v3, %v1582_v21  ;;  %v540_v8 = vrot.slane %v526_v4, %v1582_v21 }
 0x225   : > { %v652_v9 = vpop.permute.xlu0 %651 }
 0x226   : > { %v541_v10 = vcombine.low %v517_v5, %v533_v7  ;;  %v542_v11 = vcombine.high %v517_v5, %v533_v7  ;;  %v557_v12 = vcombine.low %v524_v6, %v540_v8  ;;  %v558_v13 = vcombine.high %v524_v6, %v540_v8  ;;  %v654_v14 = vpop.permute.xlu1 %653 }
 0x227   : > { %v661_v19 = vcombine.low %v650_v61, %v654_v14  ;;  %v662_v20 = vcombine.high %v650_v61, %v654_v14 }
 0x228   : > { %v549_v15 = vrot.slane %v541_v10, %v1584_v27  ;;  %v556_v16 = vrot.slane %v542_v11, %v1584_v27  ;;  %v565_v17 = vrot.slane %v557_v12, %v1584_v27  ;;  %v572_v18 = vrot.slane %v558_v13, %v1584_v27 }
 0x229   : > { %v656_v22 = vpop.permute.xlu0 %655  ;;  %v669_v34 = vrot.slane %v661_v19, %v1582_v21  ;;  %v676_v35 = vrot.slane %v662_v20, %v1582_v21 }
 0x22a   : > { %v577_v23 = vcombine.low %v549_v15, %v556_v16  ;;  %v1035_v24 = vcombine.high %v549_v15, %v556_v16  ;;  %v593_v25 = vcombine.low %v565_v17, %v572_v18  ;;  %v1036_v26 = vcombine.high %v565_v17, %v572_v18 }
 0x22b   : > { %v677_v28 = vcombine.low %v652_v9, %v656_v22  ;;  %v678_v29 = vcombine.high %v652_v9, %v656_v22 }
 0x22c   : > { %v584_v30 = vrot.slane %v577_v23, %v1582_v21  ;;  %v592_v31 = vrot.slane %v1035_v24, %v1582_v21  ;;  %v600_v32 = vrot.slane %v593_v25, %v1582_v21  ;;  %v608_v33 = vrot.slane %v1036_v26, %v1582_v21 }
 0x22d   : > { %v685_v36 = vrot.slane %v677_v28, %v1582_v21  ;;  %v692_v37 = vrot.slane %v678_v29, %v1582_v21 }
 0x22e   : > { %v609_v38 = vcombine.low %v584_v30, %v592_v31  ;;  %v610_v39 = vcombine.high %v584_v30, %v592_v31  ;;  %v625_v40 = vcombine.low %v600_v32, %v608_v33  ;;  %v626_v41 = vcombine.high %v600_v32, %v608_v33 }
 0x22f   : > { %v693_v42 = vcombine.low %v669_v34, %v685_v36  ;;  %v694_v43 = vcombine.high %v669_v34, %v685_v36  ;;  %v709_v44 = vcombine.low %v676_v35, %v692_v37  ;;  %v710_v45 = vcombine.high %v676_v35, %v692_v37 }
 0x230   : > { %v617_v46 = vrot.slane %v609_v38, %v1584_v27  ;;  %v624_v47 = vrot.slane %v610_v39, %v1584_v27  ;;  %v633_v48 = vrot.slane %v625_v40, %v1584_v27  ;;  %v640_v49 = vrot.slane %v626_v41, %v1584_v27 }
 0x231   : > { %v701_v50 = vrot.slane %v693_v42, %v1584_v27  ;;  %v708_v51 = vrot.slane %v694_v43, %v1584_v27  ;;  %v717_v52 = vrot.slane %v709_v44, %v1584_v27  ;;  %v724_v53 = vrot.slane %v710_v45, %v1584_v27 }
 0x232   : > { %v641_v54 = vcombine.low %v617_v46, %v633_v48  ;;  %v642_v55 = vcombine.high %v617_v46, %v633_v48  ;;  %v643_v56 = vcombine.low %v624_v47, %v640_v49  ;;  %v644_v57 = vcombine.high %v624_v47, %v640_v49 }
 0x233   : > { %v729_v58 = vcombine.low %v701_v50, %v708_v51  ;;  %v1037_v59 = vcombine.high %v701_v50, %v708_v51  ;;  %v745_v60 = vcombine.low %v717_v52, %v724_v53  ;;  %v1038_v61 = vcombine.high %v717_v52, %v724_v53 }
 0x234   : > { %645 = vst.msk [vmem:[%s259_s9] sm:$0xff] %vm492_vm2, %v641_v54  ;;  %646 = vst.msk [vmem:[%s259_s9 + $0x8] sm:$0xff] %vm492_vm2, %v642_v55 }
 0x235   : > { %647 = vst.msk [vmem:[%s259_s9 + $0x10] sm:$0xff] %vm492_vm2, %v643_v56  ;;  %648 = vst.msk [vmem:[%s259_s9 + $0x18] sm:$0xff] %vm492_vm2, %v644_v57  ;;  %v736_v62 = vrot.slane %v729_v58, %v1582_v21  ;;  %v744_v63 = vrot.slane %v1037_v59, %v1582_v21  ;;  %v752_v0 = vrot.slane %v745_v60, %v1582_v21 }
 0x236   : > { %v760_v1 = vrot.slane %v1038_v61, %v1582_v21 }
 0x237   : > { %1271 = shalt.err (!%p1268_p7)
}
 0x238   : > { %s1272_s21 = scalar_lea.hbm %s1681_s14, 512  ;;  %s1276_s18 = scalar_lea.hbm %s1792_s3, 1024 }
 0x239   : > { %p1273_p3 = scmp.ne.s32.totalorder %s1681_s14, %s1272_s21  ;;  %p1277_p6 = scmp.lt.u32.totalorder %s1681_s14, %s1792_s3 }
 0x23a   : > { %p1278_p8 = scmp.lt.u32.totalorder %s1276_s18, %s1272_s21  ;;  %p1280_p11 = scmp.lt.u32.totalorder %s1272_s21, %s1681_s14 }
 0x23b   : > { %p1274_p4 = pnand %p1273_p3, %p1516_p10 }
 0x23c   : > { %p1279_p12 = por %p1278_p8, %p1277_p6 }
 0x23d   : > { %p1275_p13 = pneg %p1274_p4 }
 0x23e   : > { %p1281_p0 = por %p1280_p11, %p1279_p12 }
 0x240   : > { %p1282_p5 = pnand %p1281_p0, %p1275_p13 }
 0x242   : > { %1285 = shalt.err (!%p1282_p5)
}
 0x243   : > { %1082 = dma.vmem_to_hbm [thread:$0]  (%p1516_p10), %s1683_s5, 512, %s1681_s14, %s1695_s26, %s1393_s11, %s1393_s11, %s1394_s25   ;;  %v761_v21 = vcombine.low %v736_v62, %v744_v63  ;;  %v762_v2 = vcombine.high %v736_v62, %v744_v63  ;;  %v777_v3 = vcombine.low %v752_v0, %v760_v1  ;;  %v778_v4 = vcombine.high %v752_v0, %v760_v1 }
 0x244   : > { %s266_s13 = scalar_lea.vmem [#allocation10], %s1602_s30  ;;  %s1731_s23 = scalar_lea.hbm %s1793_s4, %s1609_s27 }
 0x245   : > { %s860_s10 = sshll.u32 %s266_s13, 4  ;;  %v769_v5 = vrot.slane %v761_v21, %v1584_v27  ;;  %v776_v6 = vrot.slane %v762_v2, %v1584_v27  ;;  %v785_v7 = vrot.slane %v777_v3, %v1584_v27  ;;  %v792_v8 = vrot.slane %v778_v4, %v1584_v27  ;;  %s1396_s27 = smov [#allocation10]   ;;  %s1733_s10 = int_to_ptr.vmem [resolvable:$true] %s860_s10 }
 0x246   : > { %s1286_s30 = scalar_lea.vmem %s1733_s10, 512  ;;  %s1290_s21 = sshll.u32 %s1396_s27, 4  ;;  %s1291_s21 = int_to_ptr.vmem [resolvable:$false] %s1290_s21 }
 0x247   : > { %v793_v9 = vcombine.low %v769_v5, %v785_v7  ;;  %v794_v10 = vcombine.high %v769_v5, %v785_v7  ;;  %v795_v11 = vcombine.low %v776_v6, %v792_v8  ;;  %v796_v12 = vcombine.high %v776_v6, %v792_v8  ;;  %p1287_p9 = scmp.ne.s32.totalorder %s1733_s10, %s1286_s30  ;;  %s1292_s28 = scalar_lea.vmem %s1291_s21, 1024 }
 0x248   : > { %p1293_p7 = scmp.lt.s32.totalorder %s1733_s10, %s1291_s21  ;;  %p1294_p3 = scmp.lt.s32.totalorder %s1292_s28, %s1286_s30 }
 0x249   : > { %797 = vst.msk [vmem:[%s266_s13] sm:$0xff] %vm492_vm2, %v793_v9  ;;  %798 = vst.msk [vmem:[%s266_s13 + $0x8] sm:$0xff] %vm492_vm2, %v794_v10  ;;  %p1288_p1 = pnand %p1287_p9, %p1516_p10 }
 0x24a   : > { %799 = vst.msk [vmem:[%s266_s13 + $0x10] sm:$0xff] %vm492_vm2, %v795_v11  ;;  %800 = vst.msk [vmem:[%s266_s13 + $0x18] sm:$0xff] %vm492_vm2, %v796_v12  ;;  %p1295_p4 = por %p1294_p3, %p1293_p7 }
 0x24b   : > { %p1289_p2 = pneg %p1288_p1 }
 0x24d   : > { %p1296_p13 = pnand %p1295_p4, %p1289_p2 }
 0x24f   : > { %1299 = shalt.err (!%p1296_p13)
}
 0x250   : > { %s1300_s9 = scalar_lea.hbm %s1731_s23, 512  ;;  %s1304_s7 = scalar_lea.hbm %s1793_s4, 1024 }
 0x251   : > { %p1301_p6 = scmp.ne.s32.totalorder %s1731_s23, %s1300_s9  ;;  %p1305_p11 = scmp.lt.u32.totalorder %s1731_s23, %s1793_s4 }
 0x252   : > { %p1306_p0 = scmp.lt.u32.totalorder %s1304_s7, %s1300_s9  ;;  %p1308_p9 = scmp.lt.u32.totalorder %s1300_s9, %s1731_s23 }
 0x253   : > { %p1302_p8 = pnand %p1301_p6, %p1516_p10 }
 0x254   : > { %p1307_p5 = por %p1306_p0, %p1305_p11 }
 0x255   : > { %p1303_p12 = pneg %p1302_p8 }
 0x256   : > { %p1309_p1 = por %p1308_p9, %p1307_p5 }
 0x258   : > { %p1310_p2 = pnand %p1309_p1, %p1303_p12 }
 0x25a   : > { %1313 = shalt.err (!%p1310_p2)
}
 0x25b   : > { %1083 = dma.vmem_to_hbm [thread:$0]  (%p1516_p10), %s1733_s10, 512, %s1731_s23, %s1695_s26, %s1393_s11, %s1393_s11, %s1394_s25  }
 0x25c PF: > { %s875_s14 = sand.u32 1, %s1356_s15   ;;  %p1809_p7 = scmp.ne.s32.totalorder %s1798_s24, 0 }
 0x25d   : > { %p1810_p3 = scmp.ge.s32.totalorder %s1376_s20, 2  ;;  %s876_s30 = scalar_lea.sflag [#allocation4], %s875_s14 }
 0x25f   : > { %p1096_p4 = pnand %p1810_p3, %p1809_p7 }
 0x261   : > { %1347 = dma.done.wait (!%p1096_p4), %s876_s30, 512  }
 0x262   : > { %1349 = vsyncadd (!%p1096_p4), %s876_s30, 4294966784  ;;  %s884_s6 = sand.u32 1, %s1020_s22  }
 0x263   : > { %s885_s27 = scalar_lea.sflag [#allocation9], %s884_s6 }
 0x264   : > { %1351 = dma.done.wait (!%p1096_p4), %s885_s27, 1024  }
 0x265   : > { %1353 = vsyncadd (!%p1096_p4), %s885_s27, 4294966272  ;;  %s25_s20 = sadd.s32 1, %s1376_s20   ;;  %s1811_s15 = smov %s1360_s16 }
 0x266   : > { %p22_p10 = scmp.ge.s32.totalorder %s25_s20, 4   ;;  %s1812_s16 = smov %s1364_s17 }
 0x267   : > { %s1813_s17 = smov %s1525_s8  ;;  %s1814_s18 = smov %s1372_s19 }
 0x268   : > { %s1815_s19 = smov %s1817_s29  ;;  %24 = sbr.rel (!%p22_p10) target bundleno = 9 (0x9), region = 109 }
 0x26f   :  { %899 = vsyncpa [#allocation3], 1 }
 0x270   :  { %901 = vsyncpa [#allocation3 + $0x1], 1 }
 0x271   :  { %902 = vsyncpa [#allocation6], 1 }
 0x272   :  { %903 = vsyncpa [#allocation4], 1 }
 0x273   :  { %905 = vsyncpa [#allocation4 + $0x1], 1 }
 0x274   :  { %906 = vsyncpa [#allocation9], 1 }
 0x275   :  { %908 = vsyncpa [#allocation9 + $0x1], 1 }

</bundles_post_ra>
